<compile_context>
chip_gen: v7x
topology: tpu7x:2x2x1
jax: 0.10.0
libtpu: 0.0.40
codegen_flags: <defaults>
</compile_context>

<pallas_src>
import functools

import jax
import jax.numpy as jnp
from jax import lax
from jax.experimental import pallas as pl
from jax.experimental.pallas import tpu as pltpu

_LANE = 128
_SUBLANE = 8


def _round_up(v, m):
    return -(-v // m) * m


def _padded_vmem_bytes(rows, cols, itemsize=4):
    """f32 VMEM bytes of a (rows, cols) buffer including (8, 128) tile padding."""
    return (_round_up(max(rows, 1), _SUBLANE)
            * _round_up(max(cols, 1), _LANE) * itemsize)


def _fused_mlp_kernel(*refs, num_layers):
    """refs = (x_ref, wT_0, bT_0, ..., wT_{L-1}, bT_{L-1}, out_ref).

    Whole MLP for one batch tile in (features, batch) orientation: the large
    batch-tile dimension stays on the 128-wide lane axis while the narrow
    feature widths (10/32/16/1) sit on sublanes.  This keeps live vregs / VPU
    work small and makes the final (out_f, tb) result a lane-dense store.
    """
    x_ref = refs[0]
    o_ref = refs[-1]

    x = x_ref[...].astype(jnp.float32)                       # (tb, in_f)
    y = None
    for layer in range(num_layers):
        wT = refs[1 + 2 * layer][...].astype(jnp.float32)    # (out_f, in_f)
        bT = refs[2 + 2 * layer][...].astype(jnp.float32)    # (out_f, 1)
        if layer == 0:
            # Contract in_f of wT (axis 1) with in_f of x (axis 1) -> (out_f, tb).
            # The MXU consumes the transposed RHS directly; no XLU transpose of
            # the (tb, in_f) input block is required.
            y = lax.dot_general(
                wT, x, (((1,), (1,)), ((), ())),
                preferred_element_type=jnp.float32)
        else:
            y = jnp.dot(wT, y, preferred_element_type=jnp.float32)
        # Hidden activation: ReLU (default for act_func_name=None).
        # Output activation: ReLU (out_act = torch.nn.ReLU()).
        y = jnp.maximum(y + bT, 0.0)

    # y: (out_f, tb), batch on lanes -> unmasked lane-dense store.
    o_ref[0] = y.astype(o_ref.dtype)


def _choose_block_rows(batch, target_rows):
    # Keep >= 2 grid steps once the batch exceeds one tile so that
    # dimension_semantics=("parallel",) can shard the batch grid across v7x's
    # two TensorCores; tiles are a multiple of 8 (sublane granularity).
    tb = min(target_rows, _round_up(pl.cdiv(batch, 2), _SUBLANE))
    return max(_SUBLANE, tb)


def fused_mlp_forward(x, params, *, target_rows_per_block=4096):
    """Whole-MLP forward in ONE pallas_call.

    All weights/biases (a few KiB) are resident in VMEM via constant
    index_maps; the batch axis is tiled into large lane/sublane-aligned blocks
    (default target 4096 rows, safe w.r.t. VMEM on v5e/v6e/v7x).  The output is
    produced lane-dense as (num_blocks, out_f, tb) and reshaped to (B, out_f)
    in the wrapper.
    """
    B, in_f = x.shape
    num_layers = len(params)
    out_f = params[-1][0].shape[1]

    tb = _choose_block_rows(B, target_rows_per_block)
    num_blocks = pl.cdiv(B, tb)

    # Pre-transpose weights/biases outside the kernel (tiny XLA ops): wT is
    # (out, in), bT is (out, 1) so the kernel works in (features, batch).
    flat_inputs = [x]
    tparams = []
    for w, b in params:
        wT, bT = w.T, b.T
        tparams.append((wT, bT))
        flat_inputs += [wT, bT]

    in_specs = [pl.BlockSpec((tb, in_f), lambda i: (i, 0))]
    for wT, bT in tparams:
        in_specs.append(pl.BlockSpec(wT.shape, lambda i: (0, 0)))   # resident
        in_specs.append(pl.BlockSpec(bT.shape, lambda i: (0, 0)))   # resident
    out_spec = pl.BlockSpec((1, out_f, tb), lambda i: (i, 0, 0))

    # Explicit VMEM budget with (8, 128) lane/sublane padding:
    #   x block pads to 128 lanes (~512 B/row f32), double-buffered;
    #   lane-dense out block is only round8(out_f) x tb;
    #   weights/biases are negligible; plus live activations per layer.
    vmem = 2 * _padded_vmem_bytes(tb, in_f)                  # x (double-buffered)
    vmem += 2 * _padded_vmem_bytes(out_f, tb)                # output block
    for wT, bT in tparams:
        vmem += 2 * (_padded_vmem_bytes(*wT.shape) + _padded_vmem_bytes(*bT.shape))
        vmem += _padded_vmem_bytes(wT.shape[0], tb)          # live activation
    vmem_limit = int(min(max(2 * vmem + (4 << 20), 16 << 20), 48 << 20))

    kernel = functools.partial(_fused_mlp_kernel, num_layers=num_layers)
    out = pl.pallas_call(
        kernel,
        out_shape=jax.ShapeDtypeStruct((num_blocks, out_f, tb), x.dtype),
        grid=(num_blocks,),
        in_specs=in_specs,
        out_specs=out_spec,
        compiler_params=pltpu.CompilerParams(
            dimension_semantics=("parallel",),
            vmem_limit_bytes=vmem_limit,
        ),
    )(*flat_inputs)

    # (num_blocks, out_f, tb) -> (B, out_f): tiny contiguous XLA copy; padded
    # columns of a partial last block are sliced away here.
    out = jnp.transpose(out, (0, 2, 1)).reshape(num_blocks * tb, out_f)[:B]
    return out


class FFNNTransferPallas:
    """JAX/Pallas port of FFNN_transfer (input_size=10, target_size=1).

    Hidden activation: ReLU (default returned by set_module_torch.get_act_func
    for act_func_name=None); output activation: ReLU (out_act = torch.nn.ReLU()).
    """
    # TODO(synk): act_func_name values other than the ReLU default are not
    # implemented - set_module_torch.get_act_func is external to the spec.

    INPUT_SIZE = 10
    TARGET_SIZE = 1

    def __init__(self, hidden_layer_sizes, key):
        self.params = []
        last_size = self.INPUT_SIZE
        sizes = list(hidden_layer_sizes) + [self.TARGET_SIZE]
        for size in sizes:
            key, kw, kb = jax.random.split(key, 3)
            # Deterministic init mimicking torch.nn.Linear default:
            # U(-1/sqrt(in_f), 1/sqrt(in_f)) for both weight and bias.
            bound = 1.0 / float(last_size) ** 0.5
            w = jax.random.uniform(kw, (last_size, size), jnp.float32, -bound, bound)
            b = jax.random.uniform(kb, (1, size), jnp.float32, -bound, bound)
            self.params.append((w, b))
            last_size = size

    def __call__(self, x):
        # TODO(synk): optionally feed x in bfloat16 to halve HBM read traffic
        # (the kernel upcasts to f32 internally); kept f32 to match torch ref.
        return fused_mlp_forward(x, self.params)


def _reference_forward(params, x):
    for w, b in params:
        x = jnp.maximum(x @ w + b, 0.0)
    return x


if __name__ == "__main__":
    key = jax.random.PRNGKey(0)
    k_model, k1, k2, k3 = jax.random.split(key, 4)

    hidden_layer_sizes = [32, 16]
    model = FFNNTransferPallas(hidden_layer_sizes, k_model)

    # 1) Small batch: single grid step.
    x1 = jax.random.normal(k1, (8, FFNNTransferPallas.INPUT_SIZE), jnp.float32)
    o1 = jax.block_until_ready(model(x1))
    r1 = _reference_forward(model.params, x1)
    assert o1.shape == (8, 1), o1.shape
    assert jnp.allclose(o1, r1, atol=1e-5, rtol=1e-5)

    # 2) Batch NOT a multiple of the tile: partial last block (3 grid steps).
    x2 = jax.random.normal(k2, (300, FFNNTransferPallas.INPUT_SIZE), jnp.float32)
    o2 = jax.block_until_ready(
        fused_mlp_forward(x2, model.params, target_rows_per_block=128))
    r2 = _reference_forward(model.params, x2)
    assert o2.shape == (300, 1), o2.shape
    assert jnp.allclose(o2, r2, atol=1e-5, rtol=1e-5)

    # 3) Longer grid (16 steps) exercising the multi-block "parallel" path.
    x3 = jax.random.normal(k3, (1024, FFNNTransferPallas.INPUT_SIZE), jnp.float32)
    o3 = jax.block_until_ready(
        fused_mlp_forward(x3, model.params, target_rows_per_block=64))
    r3 = _reference_forward(model.params, x3)
    assert o3.shape == (1024, 1), o3.shape
    assert jnp.allclose(o3, r3, atol=1e-5, rtol=1e-5)

    print("KERNEL_OK")
</pallas_src>

<mosaic_0001>
module attributes {stable_mosaic.version = 11 : i64} {
  func.func @_fused_mlp_kernel(%arg0: i32, %arg1: memref<8x10xf32, #tpu.memory_space<vmem>>, %arg2: memref<32x10xf32, #tpu.memory_space<vmem>>, %arg3: memref<32x1xf32, #tpu.memory_space<vmem>>, %arg4: memref<16x32xf32, #tpu.memory_space<vmem>>, %arg5: memref<16x1xf32, #tpu.memory_space<vmem>>, %arg6: memref<1x16xf32, #tpu.memory_space<vmem>>, %arg7: memref<1x1xf32, #tpu.memory_space<vmem>>, %arg8: memref<1x1x8xf32, #tpu.memory_space<vmem>>) attributes {dimension_semantics = [#tpu.dimension_semantics<parallel>], iteration_bounds = array<i64: 1>, scalar_prefetch = 0 : i64, scratch_operands = 0 : i64, tpu.core_type = #tpu.core_type<tc>, window_params = [{transform_indices = @transform_0, window_bounds = array<i64: 8, 10>}, {pipeline_mode = #tpu.pipeline_mode<synchronous>, transform_indices = @transform_1, window_bounds = array<i64: 32, 10>}, {pipeline_mode = #tpu.pipeline_mode<synchronous>, transform_indices = @transform_2, window_bounds = array<i64: 32, 1>}, {pipeline_mode = #tpu.pipeline_mode<synchronous>, transform_indices = @transform_3, window_bounds = array<i64: 16, 32>}, {pipeline_mode = #tpu.pipeline_mode<synchronous>, transform_indices = @transform_4, window_bounds = array<i64: 16, 1>}, {pipeline_mode = #tpu.pipeline_mode<synchronous>, transform_indices = @transform_5, window_bounds = array<i64: 1, 16>}, {pipeline_mode = #tpu.pipeline_mode<synchronous>, transform_indices = @transform_6, window_bounds = array<i64: 1, 1>}, {transform_indices = @transform_7, window_bounds = array<i64: 1, 1, 8>}]} {
    %c0 = arith.constant 0 : index
    %c0_0 = arith.constant 0 : index
    %0 = vector.load %arg1[%c0, %c0_0] : memref<8x10xf32, #tpu.memory_space<vmem>>, vector<8x10xf32>
    %c0_1 = arith.constant 0 : index
    %c0_2 = arith.constant 0 : index
    %1 = vector.load %arg2[%c0_1, %c0_2] : memref<32x10xf32, #tpu.memory_space<vmem>>, vector<32x10xf32>
    %c0_3 = arith.constant 0 : index
    %c0_4 = arith.constant 0 : index
    %2 = vector.load %arg3[%c0_3, %c0_4] : memref<32x1xf32, #tpu.memory_space<vmem>>, vector<32x1xf32>
    %cst = arith.constant dense<0.000000e+00> : vector<32x8xf32>
    %3 = tpu.matmul %1, %0, %cst {dimension_numbers = #tpu.dot_dimension_numbers<[1], [1], [0], [0], [0, 0, 1, 0], [], []>} : vector<32x10xf32>, vector<8x10xf32>, vector<32x8xf32> -> vector<32x8xf32>
    %4 = vector.broadcast %2 : vector<32x1xf32> to vector<32x8xf32>
    %5 = arith.addf %3, %4 : vector<32x8xf32>
    %cst_5 = arith.constant 0.000000e+00 : f32
    %6 = vector.broadcast %cst_5 : f32 to vector<32x8xf32>
    %7 = arith.maximumf %5, %6 : vector<32x8xf32>
    %c0_6 = arith.constant 0 : index
    %c0_7 = arith.constant 0 : index
    %8 = vector.load %arg4[%c0_6, %c0_7] : memref<16x32xf32, #tpu.memory_space<vmem>>, vector<16x32xf32>
    %c0_8 = arith.constant 0 : index
    %c0_9 = arith.constant 0 : index
    %9 = vector.load %arg5[%c0_8, %c0_9] : memref<16x1xf32, #tpu.memory_space<vmem>>, vector<16x1xf32>
    %cst_10 = arith.constant dense<0.000000e+00> : vector<16x8xf32>
    %10 = tpu.matmul %8, %7, %cst_10 {dimension_numbers = #tpu.dot_dimension_numbers<[1], [0], [0], [1], [0, 0, 1, 1], [], []>} : vector<16x32xf32>, vector<32x8xf32>, vector<16x8xf32> -> vector<16x8xf32>
    %11 = vector.broadcast %9 : vector<16x1xf32> to vector<16x8xf32>
    %12 = arith.addf %10, %11 : vector<16x8xf32>
    %cst_11 = arith.constant 0.000000e+00 : f32
    %13 = vector.broadcast %cst_11 : f32 to vector<16x8xf32>
    %14 = arith.maximumf %12, %13 : vector<16x8xf32>
    %c0_12 = arith.constant 0 : index
    %c0_13 = arith.constant 0 : index
    %15 = vector.load %arg6[%c0_12, %c0_13] : memref<1x16xf32, #tpu.memory_space<vmem>>, vector<1x16xf32>
    %c0_14 = arith.constant 0 : index
    %c0_15 = arith.constant 0 : index
    %16 = vector.load %arg7[%c0_14, %c0_15] : memref<1x1xf32, #tpu.memory_space<vmem>>, vector<1x1xf32>
    %cst_16 = arith.constant dense<0.000000e+00> : vector<1x8xf32>
    %17 = tpu.matmul %15, %14, %cst_16 {dimension_numbers = #tpu.dot_dimension_numbers<[1], [0], [0], [1], [0, 0, 1, 1], [], []>} : vector<1x16xf32>, vector<16x8xf32>, vector<1x8xf32> -> vector<1x8xf32>
    %18 = vector.broadcast %16 : vector<1x1xf32> to vector<1x8xf32>
    %19 = arith.addf %17, %18 : vector<1x8xf32>
    %cst_17 = arith.constant 0.000000e+00 : f32
    %20 = vector.broadcast %cst_17 : f32 to vector<1x8xf32>
    %21 = arith.maximumf %19, %20 : vector<1x8xf32>
    %c0_18 = arith.constant 0 : index
    %c0_19 = arith.constant 0 : index
    %c0_20 = arith.constant 0 : index
    %22 = vector.load %arg8[%c0_18, %c0_19, %c0_20] : memref<1x1x8xf32, #tpu.memory_space<vmem>>, vector<1x1x8xf32>
    %23 = vector.shape_cast %22 : vector<1x1x8xf32> to vector<1x8xf32>
    %24 = vector.shape_cast %21 : vector<1x8xf32> to vector<1x1x8xf32>
    tpu.vector_store %arg8[%c0_18, %c0_19, %c0_20], %24 {strides = array<i32>} : memref<1x1x8xf32, #tpu.memory_space<vmem>>, vector<1x1x8xf32>,
    return
  }
  func.func @transform_0(%arg0: i32) -> (i32, i32) {
    %c0_i32 = arith.constant 0 : i32
    %c0_i32_0 = arith.constant 0 : i32
    return %arg0, %c0_i32 : i32, i32
  }
  func.func @transform_1(%arg0: i32) -> (i32, i32) {
    %c0_i32 = arith.constant 0 : i32
    %c0_i32_0 = arith.constant 0 : i32
    %c0_i32_1 = arith.constant 0 : i32
    return %c0_i32, %c0_i32_0 : i32, i32
  }
  func.func @transform_2(%arg0: i32) -> (i32, i32) {
    %c0_i32 = arith.constant 0 : i32
    %c0_i32_0 = arith.constant 0 : i32
    %c0_i32_1 = arith.constant 0 : i32
    return %c0_i32, %c0_i32_0 : i32, i32
  }
  func.func @transform_3(%arg0: i32) -> (i32, i32) {
    %c0_i32 = arith.constant 0 : i32
    %c0_i32_0 = arith.constant 0 : i32
    %c0_i32_1 = arith.constant 0 : i32
    return %c0_i32, %c0_i32_0 : i32, i32
  }
  func.func @transform_4(%arg0: i32) -> (i32, i32) {
    %c0_i32 = arith.constant 0 : i32
    %c0_i32_0 = arith.constant 0 : i32
    %c0_i32_1 = arith.constant 0 : i32
    return %c0_i32, %c0_i32_0 : i32, i32
  }
  func.func @transform_5(%arg0: i32) -> (i32, i32) {
    %c0_i32 = arith.constant 0 : i32
    %c0_i32_0 = arith.constant 0 : i32
    %c0_i32_1 = arith.constant 0 : i32
    return %c0_i32, %c0_i32_0 : i32, i32
  }
  func.func @transform_6(%arg0: i32) -> (i32, i32) {
    %c0_i32 = arith.constant 0 : i32
    %c0_i32_0 = arith.constant 0 : i32
    %c0_i32_1 = arith.constant 0 : i32
    return %c0_i32, %c0_i32_0 : i32, i32
  }
  func.func @transform_7(%arg0: i32) -> (i32, i32, i32) {
    %c0_i32 = arith.constant 0 : i32
    %c0_i32_0 = arith.constant 0 : i32
    %c0_i32_1 = arith.constant 0 : i32
    return %arg0, %c0_i32, %c0_i32_0 : i32, i32, i32
  }
}

</mosaic_0001>

<bundles_post_ra>
// kernel: tpu_custom_call.1
= control target key start
LH: loop header
LB: loop body
LE: loop exit
PB: predicated region body
PF: predicated region fallthrough
CT: control target
= control target key end

     0   :  { %s563_s0 = inlined_call_operand.vmem [shape: f32[8,10], index: 0, kind: input, shape index: {}]   ;;  %s564_s1 = inlined_call_operand.vmem [shape: f32[32,10], index: 1, kind: input, shape index: {}]   ;;  %s565_s2 = inlined_call_operand.vmem [shape: f32[32,1], index: 2, kind: input, shape index: {}]   ;;  %s566_s3 = inlined_call_operand.vmem [shape: f32[16,32], index: 3, kind: input, shape index: {}]   ;;  %s567_s4 = inlined_call_operand.vmem [shape: f32[16,1], index: 4, kind: input, shape index: {}]   ;;  %s568_s5 = inlined_call_operand.vmem [shape: f32[1,16], index: 5, kind: input, shape index: {}]   ;;  %s569_s6 = inlined_call_operand.<no memory space> [shape: f32[1,1], index: 6, kind: input, shape index: {}]   ;;  %s570_s7 = inlined_call_operand.hbm [shape: f32[1,1,8], index: 7, kind: output, shape index: {}]  }
   0x1   :  { %v12_v0 = vstv %s569_s6 }
   0x2   :  { %13 = vst [vmem:[#allocation2] sm:$0x1] %v12_v0 }
   0x3   :  { %v29_v1 = vld [vmem:[%s563_s0] sm:$0xff]  ;;  %vm58_vm0 = vcmask 80896   ;;  %v31_v4 = vld [vmem:[%s564_s1 + $0x8] sm:$0xff]  ;;  %v453_v5 = vmov 0   ;;  %v36_v6 = vld [vmem:[%s565_s2 + $0x10] sm:$0xff] }
   0x4   :  { %v30_v2 = vld [vmem:[%s564_s1] sm:$0xff]  ;;  %385 = vmatprep.subr.msk.mxu0 %vm58_vm0, %v29_v1  ;;  %427 = vset.pattern.permute.xlu0 %v453_v5  ;;  %v32_v7 = vld [vmem:[%s564_s1 + $0x10] sm:$0xff]  ;;  %v35_v8 = vld [vmem:[%s565_s2 + $0x8] sm:$0xff] }
   0x5   :  { %387 = vmatprep.mubr.msk.f32.mxu0 %vm58_vm0, %v30_v2  ;;  %v34_v3 = vld [vmem:[%s565_s2] sm:$0xff]  ;;  %386 = vmatpush3.xpose.msk.msra.mxu0 %vm58_vm0, %v29_v1 }
   0x6   :  { %40 = vperm.xlu0 %427, %v34_v3   ;;  %428 = vset.pattern.permute.xlu1 %v453_v5 }
   0x7   :  { %50 = vperm.xlu1 %428, %v36_v6  }
   0x8   :  { %14 = vsyncpa [#allocation4], 0  ;;  %388 = vmatmul.mubr.msk.f32.vlgmr.msra.gmra.mrb[0].mxu0 %vm58_vm0, %v31_v4  ;;  %v37_v9 = vld [vmem:[%s565_s2 + $0x18] sm:$0xff]  ;;  %v165_v11 = vld [vmem:[%s567_s4] sm:$0xff]  ;;  %vm177_vm1 = vcmask 261120   ;;  %v454_v34 = vmov 0.0|0.0   ;;  %v268_v46 = vlaneseq }
   0x9   :  { %390 = vmatprep.mubr.msk.f32.mxu0 %vm58_vm0, %v32_v7  ;;  %v33_v10 = vld [vmem:[%s564_s1 + $0x18] sm:$0xff]  ;;  %v166_v12 = vld [vmem:[%s567_s4 + $0x8] sm:$0xff]  ;;  %v262_v13 = vld [vmem:[#allocation2] sm:$0x1]  ;;  %419 = vmatprep.subr.bf16.mxu0 %v454_v34  ;;  %vm455_vm2 = vmmov 0   ;;  %v456_v35 = vmov 0.0  }
   0xa   :  { %45 = vperm.xlu0 %427, %v35_v8   ;;  %v163_v14 = vld [vmem:[%s566_s3] sm:$0xff]  ;;  %v164_v33 = vld [vmem:[%s566_s3 + $0x8] sm:$0xff]  ;;  %vm272_vm3 = vcmask 130048   ;;  %v269_v47 = vshrl.u32 %v268_v46, 7  ;;  %s457_s3 = smov [#allocation3]   ;;  %vm347_vm4 = vcmask 57344  }
   0xb   :  { %55 = vperm.xlu1 %428, %v37_v9   ;;  %401 = vmatprep.mubr.msk.f32.mxu1 %vm177_vm1, %v163_v14  ;;  %v261_v45 = vld [vmem:[%s568_s5] sm:$0x1]  ;;  %s355_s26 = sshll.u32 %s457_s3, 4  ;;  %s356_s26 = int_to_ptr.vmem [resolvable:$true] %s355_s26 }
   0xc   :  { %391 = vmatmul.mubr.msk.f32.gmra.mrb[2].mxu0 %vm58_vm0, %v33_v10  ;;  %v270_v48 = vsub.s32 0, %v269_v47  ;;  %s429_s27 = scalar_lea.vmem %s356_s26, 16  ;;  %s433_s28 = scalar_lea.vmem %s356_s26, 32 }
   0xd   :  { %408 = vmatprep.mubr.msk.f32.mxu0 %vm455_vm2, %v456_v35  ;;  %p430_p0 = scmp.ne.s32.totalorder %s356_s26, %s429_s27  ;;  %p434_p1 = scmp.lt.s32.totalorder %s356_s26, %s356_s26 }
   0xe   :  { %169 = vperm.xlu0 %427, %v165_v11   ;;  %p435_p2 = scmp.lt.s32.totalorder %s433_s28, %s429_s27 }
   0xf   :  { %174 = vperm.xlu1 %428, %v166_v12  }
  0x10   :  { %p436_p3 = por %p435_p2, %p434_p1 }
  0x12   :  { %265 = vperm.xlu0 %427, %v262_v13   ;;  %p437_p4 = pnand %p436_p3, %p430_p0 }
  0x85   :  { %v41_v15 = vpop.permute.xlu0 %40 }
  0x86   :  { %v51_v16 = vpop.permute.xlu1 %50 }
  0x89   :  { %v46_v17 = vpop.permute.xlu0 %45 }
  0x8a   :  { %v56_v23 = vpop.permute.xlu1 %55 }
  0x8d   :  { %v170_v38 = vpop.permute.xlu0 %169 }
  0x8e   :  { %v175_v36 = vpop.permute.xlu1 %174 }
  0x91   :  { %v266_v49 = vpop.permute.xlu0 %265 }
  0x92   :  { %v271_v50 = vrot.slane %v266_v49, %v270_v48 }
  0xdb   :  { %v389_v18 = vpop.f32.mrb[0].mxu0 }
  0xdc   :  { %v146_v19 = vadd.f32 %v389_v18, %v46_v17  ;;  %v140_v20 = vpop.f32.mrb[1].mxu0 }
  0xdd   :  { %v141_v21 = vadd.f32 %v140_v20, %v41_v15 }
  0xde   :  { %v160_v22 = vmax.f32 %v146_v19, 0.0 }
  0xdf   :  { %v159_v24 = vmax.f32 %v141_v21, 0.0  ;;  %v392_v25 = vpop.f32.mrb[2].mxu0 }
  0xe0   :  { %v156_v26 = vadd.f32 %v392_v25, %v56_v23  ;;  %v150_v27 = vpop.f32.mrb[3].mxu0 }
  0xe1   :  { %v151_v28 = vadd.f32 %v150_v27, %v51_v16  ;;  %v411_v29 = vpack.c.bf16 %v160_v22, %v159_v24 }
  0xe2   :  { %v162_v30 = vmax.f32 %v156_v26, 0.0 }
  0xe3   :  { %v161_v31 = vmax.f32 %v151_v28, 0.0  ;;  %412 = vmatprep.subr.bf16.mxu1 %v411_v29 }
  0xe4   :  { %414 = vmatpush3.bf16.msra.mxu1 %v411_v29 }
  0xe5   :  { %v415_v32 = vpack.c.bf16 %v162_v30, %v161_v31 }
  0xe7   :  { %416 = vmatprep.subr.bf16.mxu1 %v415_v32 }
  0xe8   :  { %418 = vmatpush3.bf16.msra.mxu1 %v415_v32 }
  0xeb   :  { %402 = vmatmul.mubr.msk.f32.vlgmr.msra.gmra.mrb[0].mxu1 %vm177_vm1, %v164_v33 }
 0x1be   :  { %v403_v37 = vpop.f32.mrb[0].mxu1 }
 0x1bf   :  { %v256_v39 = vadd.f32 %v403_v37, %v175_v36  ;;  %v250_v40 = vpop.f32.mrb[1].mxu1 }
 0x1c0   :  { %v251_v41 = vadd.f32 %v250_v40, %v170_v38 }
 0x1c1   :  { %v260_v42 = vmax.f32 %v256_v39, 0.0 }
 0x1c2   :  { %v259_v43 = vmax.f32 %v251_v41, 0.0 }
 0x1c4   :  { %v420_v44 = vpack.c.bf16 %v260_v42, %v259_v43 }
 0x1c6   :  { %421 = vmatpush3.bf16.msra.mxu0 %v420_v44 }
 0x1c9   :  { %409 = vmatmul.mubr.msk.f32.vlgmr.msra.gmra.mrb[4].mxu0 %vm272_vm3, %v261_v45 }
 0x29c   :  { %v342_v51 = vpop.f32.mrb[4].mxu0 }
 0x29d   :  { %v343_v52 = vadd.f32 %v342_v51, %v271_v50  ;;  %v410_v53 = vpop.f32.mrb[5].mxu0 }
 0x29f   :  { %v346_v54 = vmax.f32 %v343_v52, 0.0 }
 0x2a1   :  { %348 = vst.msk [vmem:[#allocation3] sm:$0x1] %vm347_vm4, %v346_v54 }
 0x2a2   :  { %440 = shalt.err (!%p437_p4)
}
 0x2a3   :  { %s441_s30 = scalar_lea.hbm %s570_s7, 16 }
 0x2a4   :  { %p442_p5 = scmp.ne.s32.totalorder %s570_s7, %s441_s30  ;;  %p445_p6 = scmp.lt.u32.totalorder %s441_s30, %s570_s7 }
 0x2a6   :  { %p447_p7 = pnand %p445_p6, %p442_p5 }
 0x2a8   :  { %450 = shalt.err (!%p447_p7)
}
 0x2a9   :  { %358 = dma.vmem_to_hbm [thread:$0]  %s356_s26, 16, %s570_s7, [#allocation4]  }
 0x2aa   :  { %451 = dma.done.wait [#allocation4], 16  }
 0x2ab   :  { %452 = vsyncadd [#allocation4], 4294967280 }
 0x2ac   :  { %362 = vsyncpa [#allocation4], 1 }

</bundles_post_ra>
